<compile_context>
chip_gen: v5e
topology: v5e:2x2
jax: 0.10.0
libtpu: 0.0.40
codegen_flags: <defaults>
</compile_context>

<pallas_src>
import functools

import jax
import jax.numpy as jnp
from jax import lax
from jax.experimental import pallas as pl
from jax.experimental.pallas import tpu as pltpu


def _ff_kernel(x_ref, w1_ref, b1_ref, w2_ref, b2_ref, gamma_ref, beta_ref,
               out_ref, *, T, K, fuse_conv1, fuse_conv2):
    """One (R = batches_per_block * T, D) row-block per grid step.

    x_ref    : (R, D)       f32   folded input rows (also the residual)
    w1_ref   : (K*D, H)     bf16  conv1 weights, tap-major along the contraction dim
    b1_ref   : (1, H)       f32
    w2_ref   : (H, K*D) bf16 (fused) or (K, H, D) bf16 (per-tap) conv2 weights
    b2_ref   : (1, D)       f32
    gamma_ref: (1, D)       f32   LayerNorm scale
    beta_ref : (1, D)       f32   LayerNorm shift
    out_ref  : (R, D)
    """
    pad = K // 2
    R, D = x_ref.shape
    H = w1_ref.shape[1]

    x = x_ref[...].astype(jnp.float32)           # (R, D) read once; also the residual
    # Per-row time index within its batch element.  Blocks always cover whole
    # batch elements, so row % T == t (replaces the old tpos input DMA stream).
    t_idx = lax.broadcasted_iota(jnp.int32, (R, 1), 0) % T

    def tap_valid(s):
        ts = t_idx + s
        return (ts >= 0) & (ts < T)              # conv zero padding / batch edge

    def shifted_x(s):
        # rolled so that row m holds x[m + s]; invalid rows zeroed (mask in f32).
        if s == 0:
            return x
        xs = pltpu.roll(x, shift=(-s) % R, axis=0)
        return jnp.where(tap_valid(s), xs, 0.0)

    # ---- Conv1d #1 (D -> H = 4D) ----
    if fuse_conv1:
        # Small D: one im2col matmul with contraction K*D; cast each column to
        # bf16 *before* the concat (no f32 (R, K*D) materialization).
        cols = [shifted_x(k - pad).astype(jnp.bfloat16) for k in range(K)]
        xcat = jnp.concatenate(cols, axis=1)                              # (R, K*D) bf16
        h = jnp.dot(xcat, w1_ref[...], preferred_element_type=jnp.float32)
    else:
        # Large D: per-tap contraction is already MXU-deep -> skip the concat.
        h = jnp.zeros((R, H), jnp.float32)
        for k in range(K):
            xk = shifted_x(k - pad).astype(jnp.bfloat16)
            h = h + jnp.dot(xk, w1_ref[k * D:(k + 1) * D, :],
                            preferred_element_type=jnp.float32)
    h = jnp.maximum(h + b1_ref[...], 0.0)                                 # bias + ReLU (f32)
    h_bf = h.astype(jnp.bfloat16)                                         # cast ONCE

    # ---- Conv1d #2 (H -> D): matmul first, then roll the small (R, D) outputs ----
    def add_tap(y, zk, s):
        if s == 0:
            return y + zk
        zr = pltpu.roll(zk, shift=(-s) % R, axis=0)   # row m <- tap contribution of row m+s
        return y + jnp.where(tap_valid(s), zr, 0.0)

    y = jnp.zeros((R, D), jnp.float32)
    if fuse_conv2:
        # Small D: one wide matmul (N = K*D) fills the MXU; split columns after.
        z = jnp.dot(h_bf, w2_ref[...], preferred_element_type=jnp.float32)  # (R, K*D) f32
        for k in range(K):
            y = add_tap(y, z[:, k * D:(k + 1) * D], k - pad)
    else:
        for k in range(K):
            zk = jnp.dot(h_bf, w2_ref[k], preferred_element_type=jnp.float32)
            y = add_tap(y, zk, k - pad)

    # ---- bias + residual (dropout == identity in eval/inference mode) ----
    y = y + b2_ref[...] + x

    # ---- LayerNorm over features: two-pass (subtract-mean) stats in f32 ----
    inv_d = 1.0 / D
    mean = jnp.sum(y, axis=-1, keepdims=True) * inv_d
    yc = y - mean
    var = jnp.sum(yc * yc, axis=-1, keepdims=True) * inv_d
    y_n = yc * lax.rsqrt(var + 1e-5)
    out_ref[...] = (y_n * gamma_ref[...] + beta_ref[...]).astype(out_ref.dtype)


def _vmem_capacity_bytes():
    try:
        return int(pltpu.get_tpu_info().vmem_capacity_bytes)
    except Exception:
        return 128 * 1024 * 1024     # conservative default (v5e/v6e)


def _block_vmem_bytes(R, D, H, K, fuse_conv1, fuse_conv2):
    """Rough per-grid-step VMEM footprint (bytes) used for block sizing."""
    io = 2 * 2 * R * D * 4                                       # x + out, double-buffered f32
    weights = K * D * H * 2 + K * H * D * 2 + (H + 3 * D) * 4    # bf16 weights (single-buffered)
    interm = R * H * 4 + R * H * 2                               # h f32 + h bf16
    interm += R * K * D * 2 if fuse_conv1 else 2 * R * D * 2     # im2col bf16 vs per-tap column
    interm += R * K * D * 4 if fuse_conv2 else 2 * R * D * 4     # fused conv2 out vs per-tap
    interm += 3 * R * D * 4                                      # rolled / masked / LN transients
    return io + weights + interm


def _pick_batches_per_block(B, T, D, H, K, fuse_conv1, fuse_conv2,
                            vmem_budget, target_rows=1024):
    """Whole batch elements per block: fit the VMEM budget, prefer >= 2 grid steps."""
    fits, aligned = [], []
    for bpb in range(1, B + 1):
        if B % bpb:
            continue
        R = bpb * T
        if R % 8 != 0 and R != B * T:        # sublane-aligned block or full-extent block
            continue
        aligned.append(bpb)
        if _block_vmem_bytes(R, D, H, K, fuse_conv1, fuse_conv2) <= vmem_budget:
            fits.append(bpb)
    if not aligned:
        return B                             # TODO(synk): pad M instead (odd T, tiny B)
    pool = fits or [min(aligned)]            # nothing fits -> smallest legal block
    multi = [b for b in pool if B // b >= 2]  # keep >= 2 grid steps (pipelining, v7x 2 TCs)
    pool = multi or pool
    under = [b for b in pool if b * T <= target_rows]
    return max(under) if under else min(pool)


def _invariant_spec(shape, single_buffer):
    """Grid-invariant operand: constant index_map, optionally single-buffered."""
    zeros = (0,) * len(shape)
    if single_buffer:
        return pl.BlockSpec(shape, lambda *_: zeros, pipeline_mode=pl.Buffered(1))
    return pl.BlockSpec(shape, lambda *_: zeros)


def feed_forward(x, w1, b1, w2, b2, gamma, beta):
    """x: (B, T, D) f32.  w1: (K, D, 4D), w2: (K, 4D, D) (tap-major, (in, out) per tap)."""
    B, T, D = x.shape
    K, _, H = w1.shape
    assert K % 2 == 1, "ff_conv_kernel_size must be odd to preserve length"

    # Narrow feature dims: fuse the K taps into one wide matmul to fill the MXU.
    fuse_conv1 = D < 256
    fuse_conv2 = D < 256

    cap = _vmem_capacity_bytes()
    vmem_budget = int(cap * 0.45)            # headroom for double-buffered I/O + scratch
    bpb = _pick_batches_per_block(B, T, D, H, K, fuse_conv1, fuse_conv2, vmem_budget)
    R = bpb * T
    M = B * T
    G = M // R

    block_bytes = _block_vmem_bytes(R, D, H, K, fuse_conv1, fuse_conv2)
    vmem_limit = int(min(cap * 3 // 4, max(32 * 1024 * 1024, 2 * block_bytes)))

    # Fold (B, T) -> M rows (metadata-only); x is DMA'd exactly once per block.
    x2 = x.reshape(M, D)
    w1_flat = w1.reshape(K * D, H).astype(jnp.bfloat16)          # tap-major contraction
    if fuse_conv2:
        # (H, K*D): column group k == w2[k]  ->  one (R,H)@(H,K*D) matmul in-kernel.
        w2_arg = jnp.transpose(w2, (1, 0, 2)).reshape(H, K * D).astype(jnp.bfloat16)
        w2_shape = (H, K * D)
    else:
        w2_arg = w2.astype(jnp.bfloat16)
        w2_shape = (K, H, D)
    b1_2d = b1.reshape(1, H).astype(jnp.float32)
    b2_2d = b2.reshape(1, D).astype(jnp.float32)
    gamma_2d = gamma.reshape(1, D).astype(jnp.float32)
    beta_2d = beta.reshape(1, D).astype(jnp.float32)

    kern = functools.partial(_ff_kernel, T=T, K=K,
                             fuse_conv1=fuse_conv1, fuse_conv2=fuse_conv2)

    def run(single_buffer):
        grid_spec = pltpu.PrefetchScalarGridSpec(
            num_scalar_prefetch=0,
            grid=(G,),
            in_specs=[
                pl.BlockSpec((R, D), lambda g: (g, 0)),          # x (also the residual)
                _invariant_spec((K * D, H), single_buffer),      # w1 (im2col-flat)
                _invariant_spec((1, H), single_buffer),          # b1
                _invariant_spec(w2_shape, single_buffer),        # w2
                _invariant_spec((1, D), single_buffer),          # b2
                _invariant_spec((1, D), single_buffer),          # gamma
                _invariant_spec((1, D), single_buffer),          # beta
            ],
            out_specs=pl.BlockSpec((R, D), lambda g: (g, 0)),
        )
        return pl.pallas_call(
            kern,
            out_shape=jax.ShapeDtypeStruct((M, D), x.dtype),
            grid_spec=grid_spec,
            compiler_params=pltpu.CompilerParams(
                dimension_semantics=("parallel",),
                vmem_limit_bytes=vmem_limit,
            ),
        )(x2, w1_flat, b1_2d, w2_arg, b2_2d, gamma_2d, beta_2d)

    try:
        out2 = run(single_buffer=True)
    except Exception:
        # Fallback for JAX versions without pipeline_mode / Buffered(1) support.
        out2 = run(single_buffer=False)

    return out2.reshape(B, T, D)


def feed_forward_ref(x, w1, b1, w2, b2, gamma, beta):
    """Pure-JAX reference with the same numerics (bf16 matmul operands, f32 accum)."""
    B, T, D = x.shape
    K, _, H = w1.shape
    pad = K // 2
    x_pad = jnp.pad(x, ((0, 0), (pad, pad), (0, 0)))
    xb = x_pad.astype(jnp.bfloat16)
    w1b = w1.astype(jnp.bfloat16)
    w2b = w2.astype(jnp.bfloat16)
    h = sum(jnp.einsum('btd,dh->bth', xb[:, k:k + T], w1b[k],
                       preferred_element_type=jnp.float32) for k in range(K)) + b1
    h = jnp.maximum(h, 0.0)
    h_pad = jnp.pad(h, ((0, 0), (pad, pad), (0, 0))).astype(jnp.bfloat16)
    y = sum(jnp.einsum('bth,hd->btd', h_pad[:, k:k + T], w2b[k],
                       preferred_element_type=jnp.float32) for k in range(K)) + b2
    y = y + x
    mean = jnp.mean(y, axis=-1, keepdims=True)
    var = jnp.mean((y - mean) ** 2, axis=-1, keepdims=True)
    return (y - mean) * lax.rsqrt(var + 1e-5) * gamma + beta


if __name__ == "__main__":
    B, T, D = 2, 8, 32          # batch, sequence length, d_model
    K = 3                       # ff_conv_kernel_size (odd -> padding K//2 keeps length)
    H = 4 * D                   # d_model * 4

    key = jax.random.PRNGKey(0)
    kx, k1, k2, kb1, kb2 = jax.random.split(key, 5)

    x = jax.random.normal(kx, (B, T, D), dtype=jnp.float32)

    # Conv1d weights stored tap-major: w[k] is (in, out), i.e. w[k,i,o] == torch_weight[o,i,k].
    w1 = jax.random.normal(k1, (K, D, H), dtype=jnp.float32) * (1.0 / jnp.sqrt(D * K))
    b1 = jax.random.normal(kb1, (H,), dtype=jnp.float32) * 0.01
    w2 = jax.random.normal(k2, (K, H, D), dtype=jnp.float32) * (1.0 / jnp.sqrt(H * K))
    b2 = jax.random.normal(kb2, (D,), dtype=jnp.float32) * 0.01
    gamma = jnp.ones((D,), jnp.float32)
    beta = jnp.zeros((D,), jnp.float32)

    out = feed_forward(x, w1, b1, w2, b2, gamma, beta)
    out = jax.block_until_ready(out)

    ref = feed_forward_ref(x, w1, b1, w2, b2, gamma, beta)
    assert out.shape == (B, T, D)
    assert jnp.allclose(out, ref, atol=2e-3, rtol=2e-3), (
        "mismatch vs reference: max abs diff = %r" % float(jnp.max(jnp.abs(out - ref))))

    print("KERNEL_OK")
</pallas_src>

<mosaic_0001>
module attributes {stable_mosaic.version = 11 : i64} {
  func.func @_ff_kernel(%arg0: i32, %arg1: memref<8x32xf32, #tpu.memory_space<vmem>>, %arg2: memref<96x128xbf16, #tpu.memory_space<vmem>>, %arg3: memref<1x128xf32, #tpu.memory_space<vmem>>, %arg4: memref<128x96xbf16, #tpu.memory_space<vmem>>, %arg5: memref<1x32xf32, #tpu.memory_space<vmem>>, %arg6: memref<1x32xf32, #tpu.memory_space<vmem>>, %arg7: memref<1x32xf32, #tpu.memory_space<vmem>>, %arg8: memref<8x32xf32, #tpu.memory_space<vmem>>) attributes {dimension_semantics = [#tpu.dimension_semantics<parallel>], iteration_bounds = array<i64: 2>, scalar_prefetch = 0 : i64, scratch_operands = 0 : i64, tpu.core_type = #tpu.core_type<tc>, window_params = [{transform_indices = @transform_0, window_bounds = array<i64: 8, 32>}, {pipeline_mode = #tpu.pipeline_mode<synchronous>, transform_indices = @transform_1, window_bounds = array<i64: 96, 128>}, {pipeline_mode = #tpu.pipeline_mode<synchronous>, transform_indices = @transform_2, window_bounds = array<i64: 1, 128>}, {pipeline_mode = #tpu.pipeline_mode<synchronous>, transform_indices = @transform_3, window_bounds = array<i64: 128, 96>}, {pipeline_mode = #tpu.pipeline_mode<synchronous>, transform_indices = @transform_4, window_bounds = array<i64: 1, 32>}, {pipeline_mode = #tpu.pipeline_mode<synchronous>, transform_indices = @transform_5, window_bounds = array<i64: 1, 32>}, {pipeline_mode = #tpu.pipeline_mode<synchronous>, transform_indices = @transform_6, window_bounds = array<i64: 1, 32>}, {transform_indices = @transform_7, window_bounds = array<i64: 8, 32>}]} {
    %c0 = arith.constant 0 : index
    %c0_0 = arith.constant 0 : index
    %0 = vector.load %arg1[%c0, %c0_0] : memref<8x32xf32, #tpu.memory_space<vmem>>, vector<8x32xf32>
    %1 = tpu.iota {dimensions = array<i32: 0>} : vector<8x1xi32>
    %c8_i32 = arith.constant 8 : i32
    %c0_i32 = arith.constant 0 : i32
    %2 = arith.cmpi eq, %c8_i32, %c0_i32 : i32
    %c1_i32 = arith.constant 1 : i32
    %3 = arith.select %2, %c1_i32, %c8_i32 : i32
    %4 = vector.broadcast %3 : i32 to vector<8x1xi32>
    %5 = arith.remsi %1, %4 : vector<8x1xi32>
    %c0_i32_1 = arith.constant 0 : i32
    %6 = vector.broadcast %c0_i32_1 : i32 to vector<8x1xi32>
    %7 = arith.cmpi ne, %5, %6 : vector<8x1xi32>
    %c0_i32_2 = arith.constant 0 : i32
    %8 = vector.broadcast %c0_i32_2 : i32 to vector<8x1xi32>
    %9 = arith.cmpi slt, %5, %8 : vector<8x1xi32>
    %c0_i32_3 = arith.constant 0 : i32
    %10 = arith.cmpi slt, %3, %c0_i32_3 : i32
    %11 = vector.broadcast %10 : i1 to vector<8x1xi1>
    %12 = vector.broadcast %11 : vector<8x1xi1> to vector<8x1xi1>
    %13 = arith.xori %9, %12 : vector<8x1xi1>
    %14 = arith.andi %13, %7 : vector<8x1xi1>
    %15 = vector.broadcast %3 : i32 to vector<8x1xi32>
    %16 = arith.addi %5, %15 : vector<8x1xi32>
    %17 = arith.select %14, %16, %5 : vector<8x1xi1>, vector<8x1xi32>
    %c1_i32_4 = arith.constant 1 : i32
    %18 = tpu.dynamic_rotate %0 by %c1_i32_4 dim 0 : vector<8x32xf32>, i32 -> vector<8x32xf32>
    %c-1_i32 = arith.constant -1 : i32
    %19 = vector.broadcast %c-1_i32 : i32 to vector<8x1xi32>
    %20 = arith.addi %17, %19 : vector<8x1xi32>
    %c0_i32_5 = arith.constant 0 : i32
    %21 = vector.broadcast %c0_i32_5 : i32 to vector<8x1xi32>
    %22 = arith.cmpi sge, %20, %21 : vector<8x1xi32>
    %c8_i32_6 = arith.constant 8 : i32
    %23 = vector.broadcast %c8_i32_6 : i32 to vector<8x1xi32>
    %24 = arith.cmpi slt, %20, %23 : vector<8x1xi32>
    %25 = arith.andi %22, %24 : vector<8x1xi1>
    %cst = arith.constant 0.000000e+00 : f32
    %26 = vector.shape_cast %25 : vector<8x1xi1> to vector<8x1xi1>
    %27 = vector.broadcast %26 : vector<8x1xi1> to vector<8x32xi1>
    %28 = vector.broadcast %cst : f32 to vector<8x32xf32>
    %29 = arith.select %27, %18, %28 : vector<8x32xi1>, vector<8x32xf32>
    %30 = arith.truncf %29 : vector<8x32xf32> to vector<8x32xbf16>
    %31 = arith.truncf %0 : vector<8x32xf32> to vector<8x32xbf16>
    %c7_i32 = arith.constant 7 : i32
    %32 = tpu.dynamic_rotate %0 by %c7_i32 dim 0 : vector<8x32xf32>, i32 -> vector<8x32xf32>
    %c1_i32_7 = arith.constant 1 : i32
    %33 = vector.broadcast %c1_i32_7 : i32 to vector<8x1xi32>
    %34 = arith.addi %17, %33 : vector<8x1xi32>
    %c0_i32_8 = arith.constant 0 : i32
    %35 = vector.broadcast %c0_i32_8 : i32 to vector<8x1xi32>
    %36 = arith.cmpi sge, %34, %35 : vector<8x1xi32>
    %c8_i32_9 = arith.constant 8 : i32
    %37 = vector.broadcast %c8_i32_9 : i32 to vector<8x1xi32>
    %38 = arith.cmpi slt, %34, %37 : vector<8x1xi32>
    %39 = arith.andi %36, %38 : vector<8x1xi1>
    %cst_10 = arith.constant 0.000000e+00 : f32
    %40 = vector.shape_cast %39 : vector<8x1xi1> to vector<8x1xi1>
    %41 = vector.broadcast %40 : vector<8x1xi1> to vector<8x32xi1>
    %42 = vector.broadcast %cst_10 : f32 to vector<8x32xf32>
    %43 = arith.select %41, %32, %42 : vector<8x32xi1>, vector<8x32xf32>
    %44 = arith.truncf %43 : vector<8x32xf32> to vector<8x32xbf16>
    %45 = tpu.concatenate %30, %31, %44 in 1 : vector<8x32xbf16>, vector<8x32xbf16>, vector<8x32xbf16> -> vector<8x96xbf16>
    %c0_11 = arith.constant 0 : index
    %c0_12 = arith.constant 0 : index
    %46 = vector.load %arg2[%c0_11, %c0_12] : memref<96x128xbf16, #tpu.memory_space<vmem>>, vector<96x128xbf16>
    %cst_13 = arith.constant dense<0.000000e+00> : vector<8x128xf32>
    %47 = tpu.matmul %45, %46, %cst_13 {dimension_numbers = #tpu.dot_dimension_numbers<[1], [0], [0], [1], [0, 0, 1, 1], [], []>} : vector<8x96xbf16>, vector<96x128xbf16>, vector<8x128xf32> -> vector<8x128xf32>
    %c0_14 = arith.constant 0 : index
    %c0_15 = arith.constant 0 : index
    %48 = vector.load %arg3[%c0_14, %c0_15] : memref<1x128xf32, #tpu.memory_space<vmem>>, vector<1x128xf32>
    %49 = vector.broadcast %48 : vector<1x128xf32> to vector<8x128xf32>
    %50 = arith.addf %47, %49 : vector<8x128xf32>
    %cst_16 = arith.constant 0.000000e+00 : f32
    %51 = vector.broadcast %cst_16 : f32 to vector<8x128xf32>
    %52 = arith.maximumf %50, %51 : vector<8x128xf32>
    %53 = arith.truncf %52 : vector<8x128xf32> to vector<8x128xbf16>
    %cst_17 = arith.constant 0.000000e+00 : f32
    %54 = vector.broadcast %cst_17 : f32 to vector<8x32xf32>
    %c0_18 = arith.constant 0 : index
    %c0_19 = arith.constant 0 : index
    %55 = vector.load %arg4[%c0_18, %c0_19] : memref<128x96xbf16, #tpu.memory_space<vmem>>, vector<128x96xbf16>
    %cst_20 = arith.constant dense<0.000000e+00> : vector<8x96xf32>
    %56 = tpu.matmul %53, %55, %cst_20 {dimension_numbers = #tpu.dot_dimension_numbers<[1], [0], [0], [1], [0, 0, 1, 1], [], []>} : vector<8x128xbf16>, vector<128x96xbf16>, vector<8x96xf32> -> vector<8x96xf32>
    %57 = vector.extract_strided_slice %56 {offsets = [0, 0], sizes = [8, 32], strides = [1, 1]} : vector<8x96xf32> to vector<8x32xf32>
    %c1_i32_21 = arith.constant 1 : i32
    %58 = tpu.dynamic_rotate %57 by %c1_i32_21 dim 0 : vector<8x32xf32>, i32 -> vector<8x32xf32>
    %c-1_i32_22 = arith.constant -1 : i32
    %59 = vector.broadcast %c-1_i32_22 : i32 to vector<8x1xi32>
    %60 = arith.addi %17, %59 : vector<8x1xi32>
    %c0_i32_23 = arith.constant 0 : i32
    %61 = vector.broadcast %c0_i32_23 : i32 to vector<8x1xi32>
    %62 = arith.cmpi sge, %60, %61 : vector<8x1xi32>
    %c8_i32_24 = arith.constant 8 : i32
    %63 = vector.broadcast %c8_i32_24 : i32 to vector<8x1xi32>
    %64 = arith.cmpi slt, %60, %63 : vector<8x1xi32>
    %65 = arith.andi %62, %64 : vector<8x1xi1>
    %cst_25 = arith.constant 0.000000e+00 : f32
    %66 = vector.shape_cast %65 : vector<8x1xi1> to vector<8x1xi1>
    %67 = vector.broadcast %66 : vector<8x1xi1> to vector<8x32xi1>
    %68 = vector.broadcast %cst_25 : f32 to vector<8x32xf32>
    %69 = arith.select %67, %58, %68 : vector<8x32xi1>, vector<8x32xf32>
    %70 = arith.addf %54, %69 : vector<8x32xf32>
    %71 = vector.extract_strided_slice %56 {offsets = [0, 32], sizes = [8, 32], strides = [1, 1]} : vector<8x96xf32> to vector<8x32xf32>
    %72 = arith.addf %70, %71 : vector<8x32xf32>
    %73 = vector.extract_strided_slice %56 {offsets = [0, 64], sizes = [8, 32], strides = [1, 1]} : vector<8x96xf32> to vector<8x32xf32>
    %c7_i32_26 = arith.constant 7 : i32
    %74 = tpu.dynamic_rotate %73 by %c7_i32_26 dim 0 : vector<8x32xf32>, i32 -> vector<8x32xf32>
    %c1_i32_27 = arith.constant 1 : i32
    %75 = vector.broadcast %c1_i32_27 : i32 to vector<8x1xi32>
    %76 = arith.addi %17, %75 : vector<8x1xi32>
    %c0_i32_28 = arith.constant 0 : i32
    %77 = vector.broadcast %c0_i32_28 : i32 to vector<8x1xi32>
    %78 = arith.cmpi sge, %76, %77 : vector<8x1xi32>
    %c8_i32_29 = arith.constant 8 : i32
    %79 = vector.broadcast %c8_i32_29 : i32 to vector<8x1xi32>
    %80 = arith.cmpi slt, %76, %79 : vector<8x1xi32>
    %81 = arith.andi %78, %80 : vector<8x1xi1>
    %cst_30 = arith.constant 0.000000e+00 : f32
    %82 = vector.shape_cast %81 : vector<8x1xi1> to vector<8x1xi1>
    %83 = vector.broadcast %82 : vector<8x1xi1> to vector<8x32xi1>
    %84 = vector.broadcast %cst_30 : f32 to vector<8x32xf32>
    %85 = arith.select %83, %74, %84 : vector<8x32xi1>, vector<8x32xf32>
    %86 = arith.addf %72, %85 : vector<8x32xf32>
    %c0_31 = arith.constant 0 : index
    %c0_32 = arith.constant 0 : index
    %87 = vector.load %arg5[%c0_31, %c0_32] : memref<1x32xf32, #tpu.memory_space<vmem>>, vector<1x32xf32>
    %88 = vector.broadcast %87 : vector<1x32xf32> to vector<8x32xf32>
    %89 = arith.addf %86, %88 : vector<8x32xf32>
    %90 = arith.addf %89, %0 : vector<8x32xf32>
    %cst_33 = arith.constant dense<0.000000e+00> : vector<8xf32>
    %91 = vector.multi_reduction <add>, %90, %cst_33 [1] : vector<8x32xf32> to vector<8xf32>
    %92 = vector.shape_cast %91 : vector<8xf32> to vector<8x1xf32>
    %cst_34 = arith.constant 3.125000e-02 : f32
    %93 = vector.broadcast %cst_34 : f32 to vector<8x1xf32>
    %94 = arith.mulf %92, %93 : vector<8x1xf32>
    %95 = vector.broadcast %94 : vector<8x1xf32> to vector<8x32xf32>
    %96 = arith.subf %90, %95 : vector<8x32xf32>
    %97 = arith.mulf %96, %96 : vector<8x32xf32>
    %cst_35 = arith.constant dense<0.000000e+00> : vector<8xf32>
    %98 = vector.multi_reduction <add>, %97, %cst_35 [1] : vector<8x32xf32> to vector<8xf32>
    %99 = vector.shape_cast %98 : vector<8xf32> to vector<8x1xf32>
    %cst_36 = arith.constant 3.125000e-02 : f32
    %100 = vector.broadcast %cst_36 : f32 to vector<8x1xf32>
    %101 = arith.mulf %99, %100 : vector<8x1xf32>
    %cst_37 = arith.constant 9.99999974E-6 : f32
    %102 = vector.broadcast %cst_37 : f32 to vector<8x1xf32>
    %103 = arith.addf %101, %102 : vector<8x1xf32>
    %104 = math.rsqrt %103 : vector<8x1xf32>
    %105 = vector.broadcast %104 : vector<8x1xf32> to vector<8x32xf32>
    %106 = arith.mulf %96, %105 : vector<8x32xf32>
    %c0_38 = arith.constant 0 : index
    %c0_39 = arith.constant 0 : index
    %107 = vector.load %arg6[%c0_38, %c0_39] : memref<1x32xf32, #tpu.memory_space<vmem>>, vector<1x32xf32>
    %108 = vector.broadcast %107 : vector<1x32xf32> to vector<8x32xf32>
    %109 = arith.mulf %106, %108 : vector<8x32xf32>
    %c0_40 = arith.constant 0 : index
    %c0_41 = arith.constant 0 : index
    %110 = vector.load %arg7[%c0_40, %c0_41] : memref<1x32xf32, #tpu.memory_space<vmem>>, vector<1x32xf32>
    %111 = vector.broadcast %110 : vector<1x32xf32> to vector<8x32xf32>
    %112 = arith.addf %109, %111 : vector<8x32xf32>
    %c0_42 = arith.constant 0 : index
    %c0_43 = arith.constant 0 : index
    %113 = vector.load %arg8[%c0_42, %c0_43] : memref<8x32xf32, #tpu.memory_space<vmem>>, vector<8x32xf32>
    tpu.vector_store %arg8[%c0_42, %c0_43], %112 {strides = array<i32>} : memref<8x32xf32, #tpu.memory_space<vmem>>, vector<8x32xf32>,
    return
  }
  func.func @transform_0(%arg0: i32) -> (i32, i32) {
    %c0_i32 = arith.constant 0 : i32
    %c0_i32_0 = arith.constant 0 : i32
    return %arg0, %c0_i32 : i32, i32
  }
  func.func @transform_1(%arg0: i32) -> (i32, i32) {
    %c0_i32 = arith.constant 0 : i32
    %c0_i32_0 = arith.constant 0 : i32
    %c0_i32_1 = arith.constant 0 : i32
    return %c0_i32, %c0_i32_0 : i32, i32
  }
  func.func @transform_2(%arg0: i32) -> (i32, i32) {
    %c0_i32 = arith.constant 0 : i32
    %c0_i32_0 = arith.constant 0 : i32
    %c0_i32_1 = arith.constant 0 : i32
    return %c0_i32, %c0_i32_0 : i32, i32
  }
  func.func @transform_3(%arg0: i32) -> (i32, i32) {
    %c0_i32 = arith.constant 0 : i32
    %c0_i32_0 = arith.constant 0 : i32
    %c0_i32_1 = arith.constant 0 : i32
    return %c0_i32, %c0_i32_0 : i32, i32
  }
  func.func @transform_4(%arg0: i32) -> (i32, i32) {
    %c0_i32 = arith.constant 0 : i32
    %c0_i32_0 = arith.constant 0 : i32
    %c0_i32_1 = arith.constant 0 : i32
    return %c0_i32, %c0_i32_0 : i32, i32
  }
  func.func @transform_5(%arg0: i32) -> (i32, i32) {
    %c0_i32 = arith.constant 0 : i32
    %c0_i32_0 = arith.constant 0 : i32
    %c0_i32_1 = arith.constant 0 : i32
    return %c0_i32, %c0_i32_0 : i32, i32
  }
  func.func @transform_6(%arg0: i32) -> (i32, i32) {
    %c0_i32 = arith.constant 0 : i32
    %c0_i32_0 = arith.constant 0 : i32
    %c0_i32_1 = arith.constant 0 : i32
    return %c0_i32, %c0_i32_0 : i32, i32
  }
  func.func @transform_7(%arg0: i32) -> (i32, i32) {
    %c0_i32 = arith.constant 0 : i32
    %c0_i32_0 = arith.constant 0 : i32
    return %arg0, %c0_i32 : i32, i32
  }
}

module attributes {stable_mosaic.version = 11 : i64} {
  func.func @_ff_kernel(%arg0: i32, %arg1: memref<8x32xf32, #tpu.memory_space<vmem>>, %arg2: memref<96x128xbf16, #tpu.memory_space<vmem>>, %arg3: memref<1x128xf32, #tpu.memory_space<vmem>>, %arg4: memref<128x96xbf16, #tpu.memory_space<vmem>>, %arg5: memref<1x32xf32, #tpu.memory_space<vmem>>, %arg6: memref<1x32xf32, #tpu.memory_space<vmem>>, %arg7: memref<1x32xf32, #tpu.memory_space<vmem>>, %arg8: memref<8x32xf32, #tpu.memory_space<vmem>>) attributes {dimension_semantics = [#tpu.dimension_semantics<parallel>], iteration_bounds = array<i64: 2>, scalar_prefetch = 0 : i64, scratch_operands = 0 : i64, tpu.core_type = #tpu.core_type<tc>, window_params = [{transform_indices = @transform_0, window_bounds = array<i64: 8, 32>}, {pipeline_mode = #tpu.pipeline_mode<synchronous>, transform_indices = @transform_1, window_bounds = array<i64: 96, 128>}, {pipeline_mode = #tpu.pipeline_mode<synchronous>, transform_indices = @transform_2, window_bounds = array<i64: 1, 128>}, {pipeline_mode = #tpu.pipeline_mode<synchronous>, transform_indices = @transform_3, window_bounds = array<i64: 128, 96>}, {pipeline_mode = #tpu.pipeline_mode<synchronous>, transform_indices = @transform_4, window_bounds = array<i64: 1, 32>}, {pipeline_mode = #tpu.pipeline_mode<synchronous>, transform_indices = @transform_5, window_bounds = array<i64: 1, 32>}, {pipeline_mode = #tpu.pipeline_mode<synchronous>, transform_indices = @transform_6, window_bounds = array<i64: 1, 32>}, {transform_indices = @transform_7, window_bounds = array<i64: 8, 32>}]} {
    %c0 = arith.constant 0 : index
    %c0_0 = arith.constant 0 : index
    %0 = vector.load %arg1[%c0, %c0_0] : memref<8x32xf32, #tpu.memory_space<vmem>>, vector<8x32xf32>
    %1 = tpu.iota {dimensions = array<i32: 0>} : vector<8x1xi32>
    %c8_i32 = arith.constant 8 : i32
    %c0_i32 = arith.constant 0 : i32
    %2 = arith.cmpi eq, %c8_i32, %c0_i32 : i32
    %c1_i32 = arith.constant 1 : i32
    %3 = arith.select %2, %c1_i32, %c8_i32 : i32
    %4 = vector.broadcast %3 : i32 to vector<8x1xi32>
    %5 = arith.remsi %1, %4 : vector<8x1xi32>
    %c0_i32_1 = arith.constant 0 : i32
    %6 = vector.broadcast %c0_i32_1 : i32 to vector<8x1xi32>
    %7 = arith.cmpi ne, %5, %6 : vector<8x1xi32>
    %c0_i32_2 = arith.constant 0 : i32
    %8 = vector.broadcast %c0_i32_2 : i32 to vector<8x1xi32>
    %9 = arith.cmpi slt, %5, %8 : vector<8x1xi32>
    %c0_i32_3 = arith.constant 0 : i32
    %10 = arith.cmpi slt, %3, %c0_i32_3 : i32
    %11 = vector.broadcast %10 : i1 to vector<8x1xi1>
    %12 = vector.broadcast %11 : vector<8x1xi1> to vector<8x1xi1>
    %13 = arith.xori %9, %12 : vector<8x1xi1>
    %14 = arith.andi %13, %7 : vector<8x1xi1>
    %15 = vector.broadcast %3 : i32 to vector<8x1xi32>
    %16 = arith.addi %5, %15 : vector<8x1xi32>
    %17 = arith.select %14, %16, %5 : vector<8x1xi1>, vector<8x1xi32>
    %c1_i32_4 = arith.constant 1 : i32
    %18 = tpu.dynamic_rotate %0 by %c1_i32_4 dim 0 : vector<8x32xf32>, i32 -> vector<8x32xf32>
    %c-1_i32 = arith.constant -1 : i32
    %19 = vector.broadcast %c-1_i32 : i32 to vector<8x1xi32>
    %20 = arith.addi %17, %19 : vector<8x1xi32>
    %c0_i32_5 = arith.constant 0 : i32
    %21 = vector.broadcast %c0_i32_5 : i32 to vector<8x1xi32>
    %22 = arith.cmpi sge, %20, %21 : vector<8x1xi32>
    %c8_i32_6 = arith.constant 8 : i32
    %23 = vector.broadcast %c8_i32_6 : i32 to vector<8x1xi32>
    %24 = arith.cmpi slt, %20, %23 : vector<8x1xi32>
    %25 = arith.andi %22, %24 : vector<8x1xi1>
    %cst = arith.constant 0.000000e+00 : f32
    %26 = vector.shape_cast %25 : vector<8x1xi1> to vector<8x1xi1>
    %27 = vector.broadcast %26 : vector<8x1xi1> to vector<8x32xi1>
    %28 = vector.broadcast %cst : f32 to vector<8x32xf32>
    %29 = arith.select %27, %18, %28 : vector<8x32xi1>, vector<8x32xf32>
    %30 = arith.truncf %29 : vector<8x32xf32> to vector<8x32xbf16>
    %31 = arith.truncf %0 : vector<8x32xf32> to vector<8x32xbf16>
    %c7_i32 = arith.constant 7 : i32
    %32 = tpu.dynamic_rotate %0 by %c7_i32 dim 0 : vector<8x32xf32>, i32 -> vector<8x32xf32>
    %c1_i32_7 = arith.constant 1 : i32
    %33 = vector.broadcast %c1_i32_7 : i32 to vector<8x1xi32>
    %34 = arith.addi %17, %33 : vector<8x1xi32>
    %c0_i32_8 = arith.constant 0 : i32
    %35 = vector.broadcast %c0_i32_8 : i32 to vector<8x1xi32>
    %36 = arith.cmpi sge, %34, %35 : vector<8x1xi32>
    %c8_i32_9 = arith.constant 8 : i32
    %37 = vector.broadcast %c8_i32_9 : i32 to vector<8x1xi32>
    %38 = arith.cmpi slt, %34, %37 : vector<8x1xi32>
    %39 = arith.andi %36, %38 : vector<8x1xi1>
    %cst_10 = arith.constant 0.000000e+00 : f32
    %40 = vector.shape_cast %39 : vector<8x1xi1> to vector<8x1xi1>
    %41 = vector.broadcast %40 : vector<8x1xi1> to vector<8x32xi1>
    %42 = vector.broadcast %cst_10 : f32 to vector<8x32xf32>
    %43 = arith.select %41, %32, %42 : vector<8x32xi1>, vector<8x32xf32>
    %44 = arith.truncf %43 : vector<8x32xf32> to vector<8x32xbf16>
    %45 = tpu.concatenate %30, %31, %44 in 1 : vector<8x32xbf16>, vector<8x32xbf16>, vector<8x32xbf16> -> vector<8x96xbf16>
    %c0_11 = arith.constant 0 : index
    %c0_12 = arith.constant 0 : index
    %46 = vector.load %arg2[%c0_11, %c0_12] : memref<96x128xbf16, #tpu.memory_space<vmem>>, vector<96x128xbf16>
    %cst_13 = arith.constant dense<0.000000e+00> : vector<8x128xf32>
    %47 = tpu.matmul %45, %46, %cst_13 {dimension_numbers = #tpu.dot_dimension_numbers<[1], [0], [0], [1], [0, 0, 1, 1], [], []>} : vector<8x96xbf16>, vector<96x128xbf16>, vector<8x128xf32> -> vector<8x128xf32>
    %c0_14 = arith.constant 0 : index
    %c0_15 = arith.constant 0 : index
    %48 = vector.load %arg3[%c0_14, %c0_15] : memref<1x128xf32, #tpu.memory_space<vmem>>, vector<1x128xf32>
    %49 = vector.broadcast %48 : vector<1x128xf32> to vector<8x128xf32>
    %50 = arith.addf %47, %49 : vector<8x128xf32>
    %cst_16 = arith.constant 0.000000e+00 : f32
    %51 = vector.broadcast %cst_16 : f32 to vector<8x128xf32>
    %52 = arith.maximumf %50, %51 : vector<8x128xf32>
    %53 = arith.truncf %52 : vector<8x128xf32> to vector<8x128xbf16>
    %cst_17 = arith.constant 0.000000e+00 : f32
    %54 = vector.broadcast %cst_17 : f32 to vector<8x32xf32>
    %c0_18 = arith.constant 0 : index
    %c0_19 = arith.constant 0 : index
    %55 = vector.load %arg4[%c0_18, %c0_19] : memref<128x96xbf16, #tpu.memory_space<vmem>>, vector<128x96xbf16>
    %cst_20 = arith.constant dense<0.000000e+00> : vector<8x96xf32>
    %56 = tpu.matmul %53, %55, %cst_20 {dimension_numbers = #tpu.dot_dimension_numbers<[1], [0], [0], [1], [0, 0, 1, 1], [], []>} : vector<8x128xbf16>, vector<128x96xbf16>, vector<8x96xf32> -> vector<8x96xf32>
    %57 = vector.extract_strided_slice %56 {offsets = [0, 0], sizes = [8, 32], strides = [1, 1]} : vector<8x96xf32> to vector<8x32xf32>
    %c1_i32_21 = arith.constant 1 : i32
    %58 = tpu.dynamic_rotate %57 by %c1_i32_21 dim 0 : vector<8x32xf32>, i32 -> vector<8x32xf32>
    %c-1_i32_22 = arith.constant -1 : i32
    %59 = vector.broadcast %c-1_i32_22 : i32 to vector<8x1xi32>
    %60 = arith.addi %17, %59 : vector<8x1xi32>
    %c0_i32_23 = arith.constant 0 : i32
    %61 = vector.broadcast %c0_i32_23 : i32 to vector<8x1xi32>
    %62 = arith.cmpi sge, %60, %61 : vector<8x1xi32>
    %c8_i32_24 = arith.constant 8 : i32
    %63 = vector.broadcast %c8_i32_24 : i32 to vector<8x1xi32>
    %64 = arith.cmpi slt, %60, %63 : vector<8x1xi32>
    %65 = arith.andi %62, %64 : vector<8x1xi1>
    %cst_25 = arith.constant 0.000000e+00 : f32
    %66 = vector.shape_cast %65 : vector<8x1xi1> to vector<8x1xi1>
    %67 = vector.broadcast %66 : vector<8x1xi1> to vector<8x32xi1>
    %68 = vector.broadcast %cst_25 : f32 to vector<8x32xf32>
    %69 = arith.select %67, %58, %68 : vector<8x32xi1>, vector<8x32xf32>
    %70 = arith.addf %54, %69 : vector<8x32xf32>
    %71 = vector.extract_strided_slice %56 {offsets = [0, 32], sizes = [8, 32], strides = [1, 1]} : vector<8x96xf32> to vector<8x32xf32>
    %72 = arith.addf %70, %71 : vector<8x32xf32>
    %73 = vector.extract_strided_slice %56 {offsets = [0, 64], sizes = [8, 32], strides = [1, 1]} : vector<8x96xf32> to vector<8x32xf32>
    %c7_i32_26 = arith.constant 7 : i32
    %74 = tpu.dynamic_rotate %73 by %c7_i32_26 dim 0 : vector<8x32xf32>, i32 -> vector<8x32xf32>
    %c1_i32_27 = arith.constant 1 : i32
    %75 = vector.broadcast %c1_i32_27 : i32 to vector<8x1xi32>
    %76 = arith.addi %17, %75 : vector<8x1xi32>
    %c0_i32_28 = arith.constant 0 : i32
    %77 = vector.broadcast %c0_i32_28 : i32 to vector<8x1xi32>
    %78 = arith.cmpi sge, %76, %77 : vector<8x1xi32>
    %c8_i32_29 = arith.constant 8 : i32
    %79 = vector.broadcast %c8_i32_29 : i32 to vector<8x1xi32>
    %80 = arith.cmpi slt, %76, %79 : vector<8x1xi32>
    %81 = arith.andi %78, %80 : vector<8x1xi1>
    %cst_30 = arith.constant 0.000000e+00 : f32
    %82 = vector.shape_cast %81 : vector<8x1xi1> to vector<8x1xi1>
    %83 = vector.broadcast %82 : vector<8x1xi1> to vector<8x32xi1>
    %84 = vector.broadcast %cst_30 : f32 to vector<8x32xf32>
    %85 = arith.select %83, %74, %84 : vector<8x32xi1>, vector<8x32xf32>
    %86 = arith.addf %72, %85 : vector<8x32xf32>
    %c0_31 = arith.constant 0 : index
    %c0_32 = arith.constant 0 : index
    %87 = vector.load %arg5[%c0_31, %c0_32] : memref<1x32xf32, #tpu.memory_space<vmem>>, vector<1x32xf32>
    %88 = vector.broadcast %87 : vector<1x32xf32> to vector<8x32xf32>
    %89 = arith.addf %86, %88 : vector<8x32xf32>
    %90 = arith.addf %89, %0 : vector<8x32xf32>
    %cst_33 = arith.constant dense<0.000000e+00> : vector<8xf32>
    %91 = vector.multi_reduction <add>, %90, %cst_33 [1] : vector<8x32xf32> to vector<8xf32>
    %92 = vector.shape_cast %91 : vector<8xf32> to vector<8x1xf32>
    %cst_34 = arith.constant 3.125000e-02 : f32
    %93 = vector.broadcast %cst_34 : f32 to vector<8x1xf32>
    %94 = arith.mulf %92, %93 : vector<8x1xf32>
    %95 = vector.broadcast %94 : vector<8x1xf32> to vector<8x32xf32>
    %96 = arith.subf %90, %95 : vector<8x32xf32>
    %97 = arith.mulf %96, %96 : vector<8x32xf32>
    %cst_35 = arith.constant dense<0.000000e+00> : vector<8xf32>
    %98 = vector.multi_reduction <add>, %97, %cst_35 [1] : vector<8x32xf32> to vector<8xf32>
    %99 = vector.shape_cast %98 : vector<8xf32> to vector<8x1xf32>
    %cst_36 = arith.constant 3.125000e-02 : f32
    %100 = vector.broadcast %cst_36 : f32 to vector<8x1xf32>
    %101 = arith.mulf %99, %100 : vector<8x1xf32>
    %cst_37 = arith.constant 9.99999974E-6 : f32
    %102 = vector.broadcast %cst_37 : f32 to vector<8x1xf32>
    %103 = arith.addf %101, %102 : vector<8x1xf32>
    %104 = math.rsqrt %103 : vector<8x1xf32>
    %105 = vector.broadcast %104 : vector<8x1xf32> to vector<8x32xf32>
    %106 = arith.mulf %96, %105 : vector<8x32xf32>
    %c0_38 = arith.constant 0 : index
    %c0_39 = arith.constant 0 : index
    %107 = vector.load %arg6[%c0_38, %c0_39] : memref<1x32xf32, #tpu.memory_space<vmem>>, vector<1x32xf32>
    %108 = vector.broadcast %107 : vector<1x32xf32> to vector<8x32xf32>
    %109 = arith.mulf %106, %108 : vector<8x32xf32>
    %c0_40 = arith.constant 0 : index
    %c0_41 = arith.constant 0 : index
    %110 = vector.load %arg7[%c0_40, %c0_41] : memref<1x32xf32, #tpu.memory_space<vmem>>, vector<1x32xf32>
    %111 = vector.broadcast %110 : vector<1x32xf32> to vector<8x32xf32>
    %112 = arith.addf %109, %111 : vector<8x32xf32>
    %c0_42 = arith.constant 0 : index
    %c0_43 = arith.constant 0 : index
    %113 = vector.load %arg8[%c0_42, %c0_43] : memref<8x32xf32, #tpu.memory_space<vmem>>, vector<8x32xf32>
    tpu.vector_store %arg8[%c0_42, %c0_43], %112 {strides = array<i32>} : memref<8x32xf32, #tpu.memory_space<vmem>>, vector<8x32xf32>,
    return
  }
  func.func @transform_0(%arg0: i32) -> (i32, i32) {
    %c0_i32 = arith.constant 0 : i32
    %c0_i32_0 = arith.constant 0 : i32
    return %arg0, %c0_i32 : i32, i32
  }
  func.func @transform_1(%arg0: i32) -> (i32, i32) {
    %c0_i32 = arith.constant 0 : i32
    %c0_i32_0 = arith.constant 0 : i32
    %c0_i32_1 = arith.constant 0 : i32
    return %c0_i32, %c0_i32_0 : i32, i32
  }
  func.func @transform_2(%arg0: i32) -> (i32, i32) {
    %c0_i32 = arith.constant 0 : i32
    %c0_i32_0 = arith.constant 0 : i32
    %c0_i32_1 = arith.constant 0 : i32
    return %c0_i32, %c0_i32_0 : i32, i32
  }
  func.func @transform_3(%arg0: i32) -> (i32, i32) {
    %c0_i32 = arith.constant 0 : i32
    %c0_i32_0 = arith.constant 0 : i32
    %c0_i32_1 = arith.constant 0 : i32
    return %c0_i32, %c0_i32_0 : i32, i32
  }
  func.func @transform_4(%arg0: i32) -> (i32, i32) {
    %c0_i32 = arith.constant 0 : i32
    %c0_i32_0 = arith.constant 0 : i32
    %c0_i32_1 = arith.constant 0 : i32
    return %c0_i32, %c0_i32_0 : i32, i32
  }
  func.func @transform_5(%arg0: i32) -> (i32, i32) {
    %c0_i32 = arith.constant 0 : i32
    %c0_i32_0 = arith.constant 0 : i32
    %c0_i32_1 = arith.constant 0 : i32
    return %c0_i32, %c0_i32_0 : i32, i32
  }
  func.func @transform_6(%arg0: i32) -> (i32, i32) {
    %c0_i32 = arith.constant 0 : i32
    %c0_i32_0 = arith.constant 0 : i32
    %c0_i32_1 = arith.constant 0 : i32
    return %c0_i32, %c0_i32_0 : i32, i32
  }
  func.func @transform_7(%arg0: i32) -> (i32, i32) {
    %c0_i32 = arith.constant 0 : i32
    %c0_i32_0 = arith.constant 0 : i32
    return %arg0, %c0_i32 : i32, i32
  }
}

</mosaic_0001>

<bundles_post_ra>
// kernel: tpu_custom_call.1
= control target key start
LH: loop header
LB: loop body
LE: loop exit
PB: predicated region body
PF: predicated region fallthrough
CT: control target
= control target key end

     0   :  { %12 = vsyncpa [#allocation3], 0  ;;  %s998_s0 = inlined_call_operand.vmem [shape: f32[16,32], index: 0, kind: input, shape index: {}]   ;;  %s999_s1 = inlined_call_operand.vmem [shape: bf16[96,128], index: 1, kind: input, shape index: {}]   ;;  %s1000_s2 = inlined_call_operand.vmem [shape: f32[1,128], index: 2, kind: input, shape index: {}]   ;;  %s1001_s3 = inlined_call_operand.vmem [shape: bf16[128,96], index: 3, kind: input, shape index: {}]   ;;  %s1002_s4 = inlined_call_operand.vmem [shape: f32[1,32], index: 4, kind: input, shape index: {}]   ;;  %s1003_s5 = inlined_call_operand.vmem [shape: f32[1,32], index: 5, kind: input, shape index: {}]   ;;  %s1004_s6 = inlined_call_operand.vmem [shape: f32[1,32], index: 6, kind: input, shape index: {}]   ;;  %s1005_s7 = inlined_call_operand.hbm [shape: f32[16,32], index: 7, kind: output, shape index: {}]  }
   0x1   :  { %14 = vsyncpa [#allocation3 + $0x1], 0  ;;  %s837_s24 = smov 0   ;;  %s839_s25 = smov 0  }
   0x2   :  { %s841_s26 = smov 0   ;;  %s843_s27 = smov 0  }
   0x3 LB: > { %s858_s28 = sadd.s32 4294967295, %s792_s27   ;;  %s601_s29 = sadd.s32 4294967294, %s792_s27   ;;  %s792_s27 = sphi %s843_s27, %s1011_s27   ;;  %s788_s26 = sphi %s841_s26, %s1010_s26   ;;  %s784_s25 = sphi %s839_s25, %s1009_s25   ;;  %s780_s24 = sphi %s837_s24, %s1008_s24  }
   0x4   : > { %s862_s30 = sadd.s32 1, %s792_s27   ;;  %s179_s8 = sadd.s32 1, %s788_s26 }
   0x5   : > { %s176_s9 = ssub.s32 %s792_s27, %s862_s30  ;;  %p189_p0 = scmp.ne.s32.totalorder %s788_s26, %s784_s25 }
   0x6   : > { %p177_p1 = scmp.eq.s32.totalorder %s176_s9, 0  ;;  %p190_p2 = scmp.eq.s32.totalorder %s858_s28, 1 }
   0x7   : > { %p195_p3 = scmp.ne.s32.totalorder %s784_s25, %s780_s24  ;;  %p196_p4 = scmp.eq.s32.totalorder %s601_s29, 1 }
   0x8   : > { %s873_s10 = scalar_select %p177_p1, %s788_s26, %s179_s8  }
   0x9   : > { %p875_p5 = por %p190_p2, %p189_p0  ;;  %p879_p6 = por %p196_p4, %p195_p3 }
   0xa   : > { %p604_p7 = scmp.ge.s32.totalorder %s792_s27, 1  ;;  %p239_p8 = scmp.lt.s32.totalorder %s792_s27, 3 }
   0xc   : > { %p240_p9 = pnand %p604_p7, %p239_p8 }
   0xd   : > { %p270_p10 = scmp.lt.s32.totalorder (!%p240_p9), %s858_s28, 1  ;;  %s794_s9 = smov (!%p240_p9), 32  }
   0xe   : > { %243 = sbr.rel (%p240_p9) target bundleno = 814 (0x32e), region = 48  ;;  %s795_s13 = smov (!%p240_p9), 64  }
   0xf   : > { %s796_s23 = smov (!%p240_p9), 96   ;;  %s665_s14 = sshll.u32 (!%p240_p9), %s858_s28, 3 }
  0x10   : > { %s537_s19 = scalar_lea.hbm (!%p240_p9), %s1005_s7, %s665_s14 }
  0x13   : > { %v276_v0 = vlaneseq  ;;  %v673_v1 = vld [vmem:[%s999_s1 + $0x28] sm:$0xff]  ;;  %v672_v2 = vld [vmem:[%s999_s1 + $0x20] sm:$0xff]  ;;  %s271_s17 = scalar_select %p270_p10, %s858_s28, 1  ;;  %v671_v7 = vld [vmem:[%s999_s1 + $0x18] sm:$0xff]  ;;  %vm319_vm2 = vcmask 261120   ;;  %vm323_vm3 = vcmask 523264  }
  0x14   : > { %383 = vmatpush.bf16.msra.mxu0 %v673_v1  ;;  %v670_v13 = vld [vmem:[%s999_s1 + $0x10] sm:$0xff]  ;;  %v669_v17 = vld [vmem:[%s999_s1 + $0x8] sm:$0xff]  ;;  %v668_v18 = vld [vmem:[%s999_s1] sm:$0xff]  ;;  %vm378_vm4 = vcmask 785408  }
  0x15   : > { %v277_v3 = vshrl.u32 %v276_v0, 7  ;;  %s606_s18 = sshll.u32 %s271_s17, 3  ;;  %v681_v19 = vld [vmem:[%s1001_s3 + $0x38] sm:$0xff]  ;;  %v680_v20 = vld [vmem:[%s1001_s3 + $0x30] sm:$0xff]  ;;  %v679_v21 = vld [vmem:[%s1001_s3 + $0x28] sm:$0xff] }
  0x16   : > { %s273_s21 = scalar_lea.vmem %s998_s0, %s606_s18  ;;  %460 = vmatpush.bf16.msra.mxu1 %v681_v19  ;;  %v678_v22 = vld [vmem:[%s1001_s3 + $0x20] sm:$0xff]  ;;  %v677_v23 = vld [vmem:[%s1001_s3 + $0x18] sm:$0xff]  ;;  %v676_v25 = vld [vmem:[%s1001_s3 + $0x10] sm:$0xff] }
  0x17   : > { %v282_v4 = vand.u32 7, %v277_v3  ;;  %v896_v5 = vld [vmem:[%s273_s21] sm:$0xff]  ;;  %v675_v33 = vld [vmem:[%s1001_s3 + $0x8] sm:$0xff] }
  0x18   : > { %384 = vmatpush.bf16.msra.mxu0 %v672_v2  ;;  %v299_v8 = vpack.c.bf16 %v896_v5, %v896_v5  ;;  %v300_v9 = vrot.slane %v896_v5, 1  ;;  %v290_v26 = vrot.slane %v896_v5, 7  ;;  %v674_v34 = vld [vmem:[%s1001_s3] sm:$0xff] }
  0x19   : > { %v898_v6 = vadd.s32 1, %v282_v4  ;;  %v291_v24 = vadd.s32 4294967295, %v282_v4  ;;  %v724_v35 = vld [vmem:[%s1000_s2] ss:$0 sm:$0xff] }
  0x1a   : > { %v310_v10 = vunpack.c.l.b16 %v299_v8  ;;  %461 = vmatpush.bf16.msra.mxu1 %v680_v20  ;;  %v725_v49 = vld [vmem:[%s1002_s4] ss:$0 sm:$0xff] }
  0x1b   : > { %vm303_vm0 = vcmp.lt.s32.totalorder %v898_v6, 8  ;;  %vm292_vm1 = vcmp.ge.s32.totalorder %v291_v24, 0  ;;  %v727_v8 = vld [vmem:[%s1004_s6] ss:$0 sm:$0xff] }
  0x1c   : > { %v307_v11 = vsel %vm303_vm0, %v300_v9, 0.0  ;;  %385 = vmatpush.bf16.msra.mxu0 %v671_v7  ;;  %v311_v14 = vpack.c.b16 %v310_v10, %v310_v10  ;;  %v297_v28 = vsel %vm292_vm1, %v290_v26, 0.0 }
  0x1d   : > { %v308_v12 = vpack.c.bf16 %v307_v11, %v307_v11  ;;  %v298_v29 = vpack.c.bf16 %v297_v28, %v297_v28 }
  0x1e   : > { %312 = vrot.lane.b32.xlu0 %v311_v14, %s794_s9  ;;  %462 = vmatpush.bf16.msra.mxu1 %v679_v21 }
  0x1f   : > { %v315_v15 = vunpack.c.l.b16 %v308_v12 }
  0x20   : > { %386 = vmatpush.bf16.msra.mxu0 %v670_v13 }
  0x21   : > { %v316_v16 = vpack.c.b16 %v315_v15, %v315_v15 }
  0x22   : > { %463 = vmatpush.bf16.msra.mxu1 %v678_v22 }
  0x24   : > { %387 = vmatpush.bf16.msra.mxu0 %v669_v17 }
  0x26   : > { %317 = vrot.lane.b32.xlu0 %v316_v16, %s795_s13  ;;  %464 = vmatpush.bf16.msra.mxu1 %v677_v23 }
  0x28   : > { %388 = vmatpush.bf16.msra.mxu0 %v668_v18 }
  0x2a   : > { %465 = vmatpush.bf16.msra.mxu1 %v676_v25 }
  0x2e   : > { %466 = vmatpush.bf16.msra.mxu1 %v675_v33 }
  0x32   : > { %467 = vmatpush.bf16.msra.mxu1 %v674_v34 }
  0x90   : > { %v313_v27 = vpop.permute.xlu0 %312 }
  0x91   : > { %v322_v30 = vsel %vm319_vm2, %v298_v29, %v313_v27 }
  0x98   : > { %v318_v31 = vpop.permute.xlu0 %317 }
  0x99   : > { %v325_v32 = vsel %vm323_vm3, %v322_v30, %v318_v31 }
  0x9a   : > { %631 = vmatmul.msk.bf16.vlgmr.msra.gmra.mxu0 %vm378_vm4, %v325_v32 }
 0x117   : > { %v390_v36 = vpop.f32.mrf.mxu0 }
 0x118   : > { %v391_v37 = vadd.f32 %v724_v35, %v390_v36 }
 0x11a   : > { %v394_v38 = vmax.f32 %v391_v37, 0.0 }
 0x11c   : > { %v395_v39 = vpack.c.bf16 %v394_v38, %v394_v38 }
 0x11e   : > { %468 = vmatmul.bf16.vlgmr.msra.gmra.mxu1 %v395_v39 }
 0x11f   : > { %v392_v40 = vpop.f32.mrf.mxu0 }
 0x19b   : > { %v469_v41 = vpop.f32.mrf.mxu1 }
 0x19c   : > { %481 = vrot.lane.b32.xlu1 %v469_v41, %s795_s13  ;;  %v473_v44 = vrot.slane %v469_v41, 7  ;;  %s267_s13 = sand.u32 1, %s784_s25  }
 0x19d   : > { %s605_s9 = sshll.u32 %s267_s13, 3  ;;  %s527_s29 = scalar_lea.sflag [#allocation3], %s267_s13 }
 0x19e   : > { %v474_v47 = vsel %vm292_vm1, %v473_v44, 0.0  ;;  %s269_s22 = scalar_lea.vmem [#allocation2], %s605_s9  ;;  %s750_s9 = scalar_lea.hbm %s1005_s7, 16 }
 0x19f   : > { %s539_s28 = sshll.u32 %s269_s22, 4  ;;  %s540_s28 = int_to_ptr.vmem [resolvable:$true] %s539_s28 }
 0x1a3   : > { %v471_v42 = vpop.f32.mrf.mxu1 }
 0x1a4   : > { %477 = vrot.lane.b32.xlu1 %v469_v41, %s796_s23  ;;  %s541_s23 = sshll.u32 %s537_s19, 4  ;;  %s542_s23 = int_to_ptr.hbm [resolvable:$true] %s541_s23 }
 0x1a5   : > { %s744_s8 = sshra.s32 %s542_s23, 4  ;;  %s745_s8 = int_to_ptr.hbm [resolvable:$true] %s744_s8 }
 0x1a6   : > { %s746_s14 = scalar_lea.hbm %s745_s8, 8  ;;  %p751_p0 = scmp.lt.s32.totalorder %s745_s8, %s1005_s7 }
 0x1a7   : > { %p747_p11 = scmp.ne.s32.totalorder %s745_s8, %s746_s14  ;;  %p752_p1 = scmp.lt.s32.totalorder %s750_s9, %s746_s14 }
 0x1a9   : > { %p748_p12 = pnand %p747_p11, %p875_p5  ;;  %p753_p2 = por %p752_p1, %p751_p0 }
 0x1ab   : > { %p749_p13 = pneg %p748_p12 }
 0x1ad   : > { %p754_p3 = pnand %p753_p2, %p749_p13 }
 0x20e   : > { %v482_v43 = vpop.permute.xlu1 %481 }
 0x20f   : > { %v484_v45 = vrot.slane %v482_v43, 1 }
 0x211   : > { %v485_v50 = vsel %vm303_vm0, %v484_v45, 0.0 }
 0x216   : > { %v478_v46 = vpop.permute.xlu1 %477 }
 0x217   : > { %v480_v48 = vadd.f32 %v478_v46, %v474_v47 }
 0x219   : > { %v486_v51 = vadd.f32 %v485_v50, %v480_v48 }
 0x21b   : > { %v491_v52 = vadd.f32 %v725_v49, %v486_v51 }
 0x21d   : > { %v492_v53 = vadd.f32 %v491_v52, %v896_v5  ;;  %v726_v5 = vld [vmem:[%s1003_s5] ss:$0 sm:$0xff] }
 0x21f   : > { %v493_v54 = vsel %vm319_vm2, %v492_v53, 0.0 }
 0x220   : > { %494 = vadd.xlane.f32.xlu2 %v493_v54 }
 0x293   : > { %v495_v55 = vpop.xlane.xlu2 %494 }
 0x294   : > { %v496_v56 = vmul.f32 0.03125, %v495_v55 }
 0x296   : > { %v497_v57 = vsub.f32 %v492_v53, %v496_v56 }
 0x298   : > { %v498_v58 = vmul.f32 %v497_v57, %v497_v57 }
 0x29a   : > { %v499_v59 = vsel %vm319_vm2, %v498_v58, 0.0 }
 0x29b   : > { %500 = vadd.xlane.f32.xlu2 %v499_v59 }
 0x30e   : > { %v501_v60 = vpop.xlane.xlu2 %500 }
 0x30f   : > { %v502_v61 = vmul.f32 0.03125, %v501_v60 }
 0x311   : > { %v503_v62 = vadd.f32 1e-05, %v502_v61 }
 0x313   : > { %728 = vrsqrt.f32 %v503_v62  ;;  %vm510_vm6 = vweird.f32 %v503_v62 }
 0x319   : > { %v729_v63 = vpop.eup %728 }
 0x31a   : > { %v505_v0 = vmul.f32 %v729_v63, %v503_v62  ;;  %vm511_vm5 = vweird.f32 %v729_v63 }
 0x31b   : > { %vm512_vm7 = vmor %vm510_vm6, %vm511_vm5 }
 0x31c   : > { %v506_v1 = vmul.f32 %v729_v63, %v505_v0 }
 0x31e   : > { %v507_v2 = vmul.f32 0.5, %v506_v1 }
 0x320   : > { %v508_v3 = vsub.f32 1.5, %v507_v2 }
 0x322   : > { %v509_v4 = vmul.f32 %v729_v63, %v508_v3 }
 0x324   : > { %v513_v6 = vsel %vm512_vm7, %v729_v63, %v509_v4 }
 0x325   : > { %v514_v7 = vmul.f32 %v513_v6, %v497_v57 }
 0x327   : > { %v519_v9 = vmul.f32 %v726_v5, %v514_v7 }
 0x329   : > { %v524_v10 = vadd.f32 %v727_v8, %v519_v9 }
 0x32b   : > { %525 = vst.msk [vmem:[%s269_s22] sm:$0xff] %vm319_vm2, %v524_v10 }
 0x32c   : > { %757 = shalt.err (!%p754_p3)
}
 0x32d   : > { %682 = dma.vmem_to_hbm [thread:$0]  (%p875_p5), %s540_s28, 128, %s542_s23, %s527_s29  }
 0x32e PF: > { %p688_p4 = scmp.ge.s32.totalorder %s792_s27, 2  ;;  %s553_s13 = sand.u32 1, %s780_s24  }
 0x32f   : > { %s554_s19 = scalar_lea.sflag [#allocation3], %s553_s13 }
 0x330   : > { %p685_p7 = pnand %p688_p4, %p879_p6 }
 0x332   : > { %p686_p8 = pneg %p685_p7 }
 0x334   : > { %775 = dma.done.wait (%p686_p8), %s554_s19, 128  }
 0x335   : > { %777 = vsyncadd (%p686_p8), %s554_s19, 4294967168  ;;  %p17_p9 = scmp.ge.s32.totalorder %s862_s30, 4   ;;  %s1008_s24 = smov %s784_s25 }
 0x336   : > { %s1009_s25 = smov %s788_s26  ;;  %s1010_s26 = smov %s873_s10 }
 0x337   : > { %s1011_s27 = smov %s862_s30  ;;  %19 = sbr.rel (!%p17_p9) target bundleno = 3 (0x3), region = 83 }
 0x33c   :  { %560 = vsyncpa [#allocation3], 1 }
 0x33d   :  { %562 = vsyncpa [#allocation3 + $0x1], 1 }

// kernel: tpu_custom_call.1
= control target key start
LH: loop header
LB: loop body
LE: loop exit
PB: predicated region body
PF: predicated region fallthrough
CT: control target
= control target key end

     0   :  { %12 = vsyncpa [#allocation3], 0  ;;  %s998_s0 = inlined_call_operand.vmem [shape: f32[16,32], index: 0, kind: input, shape index: {}]   ;;  %s999_s1 = inlined_call_operand.vmem [shape: bf16[96,128], index: 1, kind: input, shape index: {}]   ;;  %s1000_s2 = inlined_call_operand.vmem [shape: f32[1,128], index: 2, kind: input, shape index: {}]   ;;  %s1001_s3 = inlined_call_operand.vmem [shape: bf16[128,96], index: 3, kind: input, shape index: {}]   ;;  %s1002_s4 = inlined_call_operand.vmem [shape: f32[1,32], index: 4, kind: input, shape index: {}]   ;;  %s1003_s5 = inlined_call_operand.vmem [shape: f32[1,32], index: 5, kind: input, shape index: {}]   ;;  %s1004_s6 = inlined_call_operand.vmem [shape: f32[1,32], index: 6, kind: input, shape index: {}]   ;;  %s1005_s7 = inlined_call_operand.hbm [shape: f32[16,32], index: 7, kind: output, shape index: {}]  }
   0x1   :  { %14 = vsyncpa [#allocation3 + $0x1], 0  ;;  %s837_s24 = smov 0   ;;  %s839_s25 = smov 0  }
   0x2   :  { %s841_s26 = smov 0   ;;  %s843_s27 = smov 0  }
   0x3 LB: > { %s858_s28 = sadd.s32 4294967295, %s792_s27   ;;  %s601_s29 = sadd.s32 4294967294, %s792_s27   ;;  %s792_s27 = sphi %s843_s27, %s1011_s27   ;;  %s788_s26 = sphi %s841_s26, %s1010_s26   ;;  %s784_s25 = sphi %s839_s25, %s1009_s25   ;;  %s780_s24 = sphi %s837_s24, %s1008_s24  }
   0x4   : > { %s862_s30 = sadd.s32 1, %s792_s27   ;;  %s179_s8 = sadd.s32 1, %s788_s26 }
   0x5   : > { %s176_s9 = ssub.s32 %s792_s27, %s862_s30  ;;  %p189_p0 = scmp.ne.s32.totalorder %s788_s26, %s784_s25 }
   0x6   : > { %p177_p1 = scmp.eq.s32.totalorder %s176_s9, 0  ;;  %p190_p2 = scmp.eq.s32.totalorder %s858_s28, 1 }
   0x7   : > { %p195_p3 = scmp.ne.s32.totalorder %s784_s25, %s780_s24  ;;  %p196_p4 = scmp.eq.s32.totalorder %s601_s29, 1 }
   0x8   : > { %s873_s10 = scalar_select %p177_p1, %s788_s26, %s179_s8  }
   0x9   : > { %p875_p5 = por %p190_p2, %p189_p0  ;;  %p879_p6 = por %p196_p4, %p195_p3 }
   0xa   : > { %p604_p7 = scmp.ge.s32.totalorder %s792_s27, 1  ;;  %p239_p8 = scmp.lt.s32.totalorder %s792_s27, 3 }
   0xc   : > { %p240_p9 = pnand %p604_p7, %p239_p8 }
   0xd   : > { %p270_p10 = scmp.lt.s32.totalorder (!%p240_p9), %s858_s28, 1  ;;  %s794_s9 = smov (!%p240_p9), 32  }
   0xe   : > { %243 = sbr.rel (%p240_p9) target bundleno = 814 (0x32e), region = 48  ;;  %s795_s13 = smov (!%p240_p9), 64  }
   0xf   : > { %s796_s23 = smov (!%p240_p9), 96   ;;  %s665_s14 = sshll.u32 (!%p240_p9), %s858_s28, 3 }
  0x10   : > { %s537_s19 = scalar_lea.hbm (!%p240_p9), %s1005_s7, %s665_s14 }
  0x13   : > { %v276_v0 = vlaneseq  ;;  %v673_v1 = vld [vmem:[%s999_s1 + $0x28] sm:$0xff]  ;;  %v672_v2 = vld [vmem:[%s999_s1 + $0x20] sm:$0xff]  ;;  %s271_s17 = scalar_select %p270_p10, %s858_s28, 1  ;;  %v671_v7 = vld [vmem:[%s999_s1 + $0x18] sm:$0xff]  ;;  %vm319_vm2 = vcmask 261120   ;;  %vm323_vm3 = vcmask 523264  }
  0x14   : > { %383 = vmatpush.bf16.msra.mxu0 %v673_v1  ;;  %v670_v13 = vld [vmem:[%s999_s1 + $0x10] sm:$0xff]  ;;  %v669_v17 = vld [vmem:[%s999_s1 + $0x8] sm:$0xff]  ;;  %v668_v18 = vld [vmem:[%s999_s1] sm:$0xff]  ;;  %vm378_vm4 = vcmask 785408  }
  0x15   : > { %v277_v3 = vshrl.u32 %v276_v0, 7  ;;  %s606_s18 = sshll.u32 %s271_s17, 3  ;;  %v681_v19 = vld [vmem:[%s1001_s3 + $0x38] sm:$0xff]  ;;  %v680_v20 = vld [vmem:[%s1001_s3 + $0x30] sm:$0xff]  ;;  %v679_v21 = vld [vmem:[%s1001_s3 + $0x28] sm:$0xff] }
  0x16   : > { %s273_s21 = scalar_lea.vmem %s998_s0, %s606_s18  ;;  %460 = vmatpush.bf16.msra.mxu1 %v681_v19  ;;  %v678_v22 = vld [vmem:[%s1001_s3 + $0x20] sm:$0xff]  ;;  %v677_v23 = vld [vmem:[%s1001_s3 + $0x18] sm:$0xff]  ;;  %v676_v25 = vld [vmem:[%s1001_s3 + $0x10] sm:$0xff] }
  0x17   : > { %v282_v4 = vand.u32 7, %v277_v3  ;;  %v896_v5 = vld [vmem:[%s273_s21] sm:$0xff]  ;;  %v675_v33 = vld [vmem:[%s1001_s3 + $0x8] sm:$0xff] }
  0x18   : > { %384 = vmatpush.bf16.msra.mxu0 %v672_v2  ;;  %v299_v8 = vpack.c.bf16 %v896_v5, %v896_v5  ;;  %v300_v9 = vrot.slane %v896_v5, 1  ;;  %v290_v26 = vrot.slane %v896_v5, 7  ;;  %v674_v34 = vld [vmem:[%s1001_s3] sm:$0xff] }
  0x19   : > { %v898_v6 = vadd.s32 1, %v282_v4  ;;  %v291_v24 = vadd.s32 4294967295, %v282_v4  ;;  %v724_v35 = vld [vmem:[%s1000_s2] ss:$0 sm:$0xff] }
  0x1a   : > { %v310_v10 = vunpack.c.l.b16 %v299_v8  ;;  %461 = vmatpush.bf16.msra.mxu1 %v680_v20  ;;  %v725_v49 = vld [vmem:[%s1002_s4] ss:$0 sm:$0xff] }
  0x1b   : > { %vm303_vm0 = vcmp.lt.s32.totalorder %v898_v6, 8  ;;  %vm292_vm1 = vcmp.ge.s32.totalorder %v291_v24, 0  ;;  %v727_v8 = vld [vmem:[%s1004_s6] ss:$0 sm:$0xff] }
  0x1c   : > { %v307_v11 = vsel %vm303_vm0, %v300_v9, 0.0  ;;  %385 = vmatpush.bf16.msra.mxu0 %v671_v7  ;;  %v311_v14 = vpack.c.b16 %v310_v10, %v310_v10  ;;  %v297_v28 = vsel %vm292_vm1, %v290_v26, 0.0 }
  0x1d   : > { %v308_v12 = vpack.c.bf16 %v307_v11, %v307_v11  ;;  %v298_v29 = vpack.c.bf16 %v297_v28, %v297_v28 }
  0x1e   : > { %312 = vrot.lane.b32.xlu0 %v311_v14, %s794_s9  ;;  %462 = vmatpush.bf16.msra.mxu1 %v679_v21 }
  0x1f   : > { %v315_v15 = vunpack.c.l.b16 %v308_v12 }
  0x20   : > { %386 = vmatpush.bf16.msra.mxu0 %v670_v13 }
  0x21   : > { %v316_v16 = vpack.c.b16 %v315_v15, %v315_v15 }
  0x22   : > { %463 = vmatpush.bf16.msra.mxu1 %v678_v22 }
  0x24   : > { %387 = vmatpush.bf16.msra.mxu0 %v669_v17 }
  0x26   : > { %317 = vrot.lane.b32.xlu0 %v316_v16, %s795_s13  ;;  %464 = vmatpush.bf16.msra.mxu1 %v677_v23 }
  0x28   : > { %388 = vmatpush.bf16.msra.mxu0 %v668_v18 }
  0x2a   : > { %465 = vmatpush.bf16.msra.mxu1 %v676_v25 }
  0x2e   : > { %466 = vmatpush.bf16.msra.mxu1 %v675_v33 }
  0x32   : > { %467 = vmatpush.bf16.msra.mxu1 %v674_v34 }
  0x90   : > { %v313_v27 = vpop.permute.xlu0 %312 }
  0x91   : > { %v322_v30 = vsel %vm319_vm2, %v298_v29, %v313_v27 }
  0x98   : > { %v318_v31 = vpop.permute.xlu0 %317 }
  0x99   : > { %v325_v32 = vsel %vm323_vm3, %v322_v30, %v318_v31 }
  0x9a   : > { %631 = vmatmul.msk.bf16.vlgmr.msra.gmra.mxu0 %vm378_vm4, %v325_v32 }
 0x117   : > { %v390_v36 = vpop.f32.mrf.mxu0 }
 0x118   : > { %v391_v37 = vadd.f32 %v724_v35, %v390_v36 }
 0x11a   : > { %v394_v38 = vmax.f32 %v391_v37, 0.0 }
 0x11c   : > { %v395_v39 = vpack.c.bf16 %v394_v38, %v394_v38 }
 0x11e   : > { %468 = vmatmul.bf16.vlgmr.msra.gmra.mxu1 %v395_v39 }
 0x11f   : > { %v392_v40 = vpop.f32.mrf.mxu0 }
 0x19b   : > { %v469_v41 = vpop.f32.mrf.mxu1 }
 0x19c   : > { %481 = vrot.lane.b32.xlu1 %v469_v41, %s795_s13  ;;  %v473_v44 = vrot.slane %v469_v41, 7  ;;  %s267_s13 = sand.u32 1, %s784_s25  }
 0x19d   : > { %s605_s9 = sshll.u32 %s267_s13, 3  ;;  %s527_s29 = scalar_lea.sflag [#allocation3], %s267_s13 }
 0x19e   : > { %v474_v47 = vsel %vm292_vm1, %v473_v44, 0.0  ;;  %s269_s22 = scalar_lea.vmem [#allocation2], %s605_s9  ;;  %s750_s9 = scalar_lea.hbm %s1005_s7, 16 }
 0x19f   : > { %s539_s28 = sshll.u32 %s269_s22, 4  ;;  %s540_s28 = int_to_ptr.vmem [resolvable:$true] %s539_s28 }
 0x1a3   : > { %v471_v42 = vpop.f32.mrf.mxu1 }
 0x1a4   : > { %477 = vrot.lane.b32.xlu1 %v469_v41, %s796_s23  ;;  %s541_s23 = sshll.u32 %s537_s19, 4  ;;  %s542_s23 = int_to_ptr.hbm [resolvable:$true] %s541_s23 }
 0x1a5   : > { %s744_s8 = sshra.s32 %s542_s23, 4  ;;  %s745_s8 = int_to_ptr.hbm [resolvable:$true] %s744_s8 }
 0x1a6   : > { %s746_s14 = scalar_lea.hbm %s745_s8, 8  ;;  %p751_p0 = scmp.lt.s32.totalorder %s745_s8, %s1005_s7 }
 0x1a7   : > { %p747_p11 = scmp.ne.s32.totalorder %s745_s8, %s746_s14  ;;  %p752_p1 = scmp.lt.s32.totalorder %s750_s9, %s746_s14 }
 0x1a9   : > { %p748_p12 = pnand %p747_p11, %p875_p5  ;;  %p753_p2 = por %p752_p1, %p751_p0 }
 0x1ab   : > { %p749_p13 = pneg %p748_p12 }
 0x1ad   : > { %p754_p3 = pnand %p753_p2, %p749_p13 }
 0x20e   : > { %v482_v43 = vpop.permute.xlu1 %481 }
 0x20f   : > { %v484_v45 = vrot.slane %v482_v43, 1 }
 0x211   : > { %v485_v50 = vsel %vm303_vm0, %v484_v45, 0.0 }
 0x216   : > { %v478_v46 = vpop.permute.xlu1 %477 }
 0x217   : > { %v480_v48 = vadd.f32 %v478_v46, %v474_v47 }
 0x219   : > { %v486_v51 = vadd.f32 %v485_v50, %v480_v48 }
 0x21b   : > { %v491_v52 = vadd.f32 %v725_v49, %v486_v51 }
 0x21d   : > { %v492_v53 = vadd.f32 %v491_v52, %v896_v5  ;;  %v726_v5 = vld [vmem:[%s1003_s5] ss:$0 sm:$0xff] }
 0x21f   : > { %v493_v54 = vsel %vm319_vm2, %v492_v53, 0.0 }
 0x220   : > { %494 = vadd.xlane.f32.xlu2 %v493_v54 }
 0x293   : > { %v495_v55 = vpop.xlane.xlu2 %494 }
 0x294   : > { %v496_v56 = vmul.f32 0.03125, %v495_v55 }
 0x296   : > { %v497_v57 = vsub.f32 %v492_v53, %v496_v56 }
 0x298   : > { %v498_v58 = vmul.f32 %v497_v57, %v497_v57 }
 0x29a   : > { %v499_v59 = vsel %vm319_vm2, %v498_v58, 0.0 }
 0x29b   : > { %500 = vadd.xlane.f32.xlu2 %v499_v59 }
 0x30e   : > { %v501_v60 = vpop.xlane.xlu2 %500 }
 0x30f   : > { %v502_v61 = vmul.f32 0.03125, %v501_v60 }
 0x311   : > { %v503_v62 = vadd.f32 1e-05, %v502_v61 }
 0x313   : > { %728 = vrsqrt.f32 %v503_v62  ;;  %vm510_vm6 = vweird.f32 %v503_v62 }
 0x319   : > { %v729_v63 = vpop.eup %728 }
 0x31a   : > { %v505_v0 = vmul.f32 %v729_v63, %v503_v62  ;;  %vm511_vm5 = vweird.f32 %v729_v63 }
 0x31b   : > { %vm512_vm7 = vmor %vm510_vm6, %vm511_vm5 }
 0x31c   : > { %v506_v1 = vmul.f32 %v729_v63, %v505_v0 }
 0x31e   : > { %v507_v2 = vmul.f32 0.5, %v506_v1 }
 0x320   : > { %v508_v3 = vsub.f32 1.5, %v507_v2 }
 0x322   : > { %v509_v4 = vmul.f32 %v729_v63, %v508_v3 }
 0x324   : > { %v513_v6 = vsel %vm512_vm7, %v729_v63, %v509_v4 }
 0x325   : > { %v514_v7 = vmul.f32 %v513_v6, %v497_v57 }
 0x327   : > { %v519_v9 = vmul.f32 %v726_v5, %v514_v7 }
 0x329   : > { %v524_v10 = vadd.f32 %v727_v8, %v519_v9 }
 0x32b   : > { %525 = vst.msk [vmem:[%s269_s22] sm:$0xff] %vm319_vm2, %v524_v10 }
 0x32c   : > { %757 = shalt.err (!%p754_p3)
}
 0x32d   : > { %682 = dma.vmem_to_hbm [thread:$0]  (%p875_p5), %s540_s28, 128, %s542_s23, %s527_s29  }
 0x32e PF: > { %p688_p4 = scmp.ge.s32.totalorder %s792_s27, 2  ;;  %s553_s13 = sand.u32 1, %s780_s24  }
 0x32f   : > { %s554_s19 = scalar_lea.sflag [#allocation3], %s553_s13 }
 0x330   : > { %p685_p7 = pnand %p688_p4, %p879_p6 }
 0x332   : > { %p686_p8 = pneg %p685_p7 }
 0x334   : > { %775 = dma.done.wait (%p686_p8), %s554_s19, 128  }
 0x335   : > { %777 = vsyncadd (%p686_p8), %s554_s19, 4294967168  ;;  %p17_p9 = scmp.ge.s32.totalorder %s862_s30, 4   ;;  %s1008_s24 = smov %s784_s25 }
 0x336   : > { %s1009_s25 = smov %s788_s26  ;;  %s1010_s26 = smov %s873_s10 }
 0x337   : > { %s1011_s27 = smov %s862_s30  ;;  %19 = sbr.rel (!%p17_p9) target bundleno = 3 (0x3), region = 83 }
 0x33c   :  { %560 = vsyncpa [#allocation3], 1 }
 0x33d   :  { %562 = vsyncpa [#allocation3 + $0x1], 1 }

</bundles_post_ra>
